<compile_context>
chip_gen: v7x
topology: tpu7x:2x2x1
jax: 0.10.0
libtpu: 0.0.40
codegen_flags: <defaults>
</compile_context>

<pallas_src>
import functools

import jax
import jax.numpy as jnp
from jax.experimental import pallas as pl
from jax.experimental.pallas import tpu as pltpu


def _dropblock_kernel(block_size, count_m, x_ref, mpad_ref, o_ref):
    """Fused DropBlock body.

    x_ref:    (BC, H, W)            input activations
    mpad_ref: (BC, H+bs-1, W+bs-1)  Bernoulli mask, zero-padded by bs-1 per side
    o_ref:    (BC, H, W)            output
    """
    bc, h, w = x_ref.shape

    # Dilate the sampled mask with a bs x bs window (stride-1 VALID max over the
    # pre-padded mask): dil[y, x] = 1 iff some sampled point wipes pixel (y, x).
    dil = mpad_ref[:, 0:h, 0:w]
    for dy in range(block_size):
        for dx in range(block_size):
            if dy == 0 and dx == 0:
                continue
            dil = jnp.maximum(dil, mpad_ref[:, dy:dy + h, dx:dx + w])
    block_mask = 1.0 - dil

    # Global renormalisation factor countM / count_ones. The whole problem lives in
    # this single block, so the global reduction is just in-register sums
    # (lane -> sublane -> leading dim, all keepdims to stay >= 1 per axis).
    count_ones = jnp.sum(block_mask, axis=2, keepdims=True)   # (BC, H, 1)
    count_ones = jnp.sum(count_ones, axis=1, keepdims=True)   # (BC, 1, 1)
    count_ones = jnp.sum(count_ones, axis=0, keepdims=True)   # (1, 1, 1)
    scale = count_m / count_ones

    o_ref[...] = x_ref[...] * block_mask * scale


def dropblock(x, gamma, *, block_size, key, training=True):
    """DropBlock forward. x: (B, C, H, W) float32; gamma: drop probability."""
    if not training:
        return x

    b, c, h, w = x.shape
    bs = block_size
    hm, wm = h - (bs - 1), w - (bs - 1)

    # Bernoulli sample (wrapper-side RNG, see TODO above).
    mask = jax.random.bernoulli(key, gamma, (b, c, hm, wm)).astype(jnp.float32)
    # Zero-pad by (bs-1) on every side so the in-kernel dilation is a plain
    # stride-1 VALID bs x bs max over contiguous slices.
    mpad = jnp.pad(mask, ((0, 0), (0, 0), (bs - 1, bs - 1), (bs - 1, bs - 1)))

    bc = b * c
    hp, wp = h + bs - 1, w + bs - 1
    x2 = x.reshape(bc, h, w).astype(jnp.float32)
    m2 = mpad.reshape(bc, hp, wp)
    count_m = float(bc * h * w)

    out = pl.pallas_call(
        functools.partial(_dropblock_kernel, bs, count_m),
        out_shape=jax.ShapeDtypeStruct((bc, h, w), jnp.float32),
        grid_spec=pltpu.PrefetchScalarGridSpec(
            num_scalar_prefetch=0,
            grid=(1,),
            in_specs=[
                pl.BlockSpec((bc, h, w), lambda i: (0, 0, 0)),
                pl.BlockSpec((bc, hp, wp), lambda i: (0, 0, 0)),
            ],
            out_specs=pl.BlockSpec((bc, h, w), lambda i: (0, 0, 0)),
        ),
        compiler_params=pltpu.CompilerParams(
            dimension_semantics=("arbitrary",)),
    )(x2, m2)
    return out.reshape(b, c, h, w)


def _reference(x, mask, block_size):
    """Pure-JAX reference reproducing the torch DropBlock math (same mask)."""
    bs = block_size
    mpad = jnp.pad(mask, ((0, 0), (0, 0), (bs - 1, bs - 1), (bs - 1, bs - 1)))
    dil = jax.lax.reduce_window(mpad, -jnp.inf, jax.lax.max,
                                (1, 1, bs, bs), (1, 1, 1, 1), "VALID")
    block_mask = 1.0 - dil
    count_m = block_mask.size
    count_ones = block_mask.sum()
    return block_mask * x * (count_m / count_ones)


if __name__ == "__main__":
    key = jax.random.PRNGKey(0)
    kx, km = jax.random.split(key)

    b, c, h, w = 2, 4, 16, 16
    block_size = 3
    gamma = 0.1

    x = jax.random.normal(kx, (b, c, h, w), jnp.float32)

    # Training-mode path through the Pallas kernel.
    out = dropblock(x, gamma, block_size=block_size, key=km, training=True)
    out = jax.block_until_ready(out)
    assert out.shape == (b, c, h, w), out.shape

    # Rebuild the same Bernoulli sample and check against the pure-JAX reference.
    hm, wm = h - (block_size - 1), w - (block_size - 1)
    mask = jax.random.bernoulli(km, gamma, (b, c, hm, wm)).astype(jnp.float32)
    ref = _reference(x, mask, block_size)
    assert jnp.allclose(out, ref, atol=1e-5, rtol=1e-5), (
        float(jnp.max(jnp.abs(out - ref))))

    # Eval mode is the identity, matching the PyTorch module.
    out_eval = dropblock(x, gamma, block_size=block_size, key=km, training=False)
    assert jnp.allclose(out_eval, x)

    print("KERNEL_OK")
</pallas_src>

<mosaic_0001>
module attributes {stable_mosaic.version = 11 : i64} {
  func.func @_dropblock_kernel(%arg0: i32, %arg1: memref<8x16x16xf32, #tpu.memory_space<vmem>>, %arg2: memref<8x18x18xf32, #tpu.memory_space<vmem>>, %arg3: memref<8x16x16xf32, #tpu.memory_space<vmem>>) attributes {dimension_semantics = [#tpu.dimension_semantics<arbitrary>], iteration_bounds = array<i64: 1>, scalar_prefetch = 0 : i64, scratch_operands = 0 : i64, tpu.core_type = #tpu.core_type<tc>, window_params = [{pipeline_mode = #tpu.pipeline_mode<synchronous>, transform_indices = @transform_0, window_bounds = array<i64: 8, 16, 16>}, {pipeline_mode = #tpu.pipeline_mode<synchronous>, transform_indices = @transform_1, window_bounds = array<i64: 8, 18, 18>}, {pipeline_mode = #tpu.pipeline_mode<synchronous>, transform_indices = @transform_2, window_bounds = array<i64: 8, 16, 16>}]} {
    %c0 = arith.constant 0 : index
    %c0_0 = arith.constant 0 : index
    %c0_1 = arith.constant 0 : index
    %0 = vector.load %arg2[%c0, %c0_0, %c0_1] : memref<8x18x18xf32, #tpu.memory_space<vmem>>, vector<8x16x16xf32>
    %c0_2 = arith.constant 0 : index
    %c0_3 = arith.constant 0 : index
    %c1 = arith.constant 1 : index
    %1 = vector.load %arg2[%c0_2, %c0_3, %c1] : memref<8x18x18xf32, #tpu.memory_space<vmem>>, vector<8x16x16xf32>
    %2 = arith.maximumf %0, %1 : vector<8x16x16xf32>
    %c0_4 = arith.constant 0 : index
    %c0_5 = arith.constant 0 : index
    %c2 = arith.constant 2 : index
    %3 = vector.load %arg2[%c0_4, %c0_5, %c2] : memref<8x18x18xf32, #tpu.memory_space<vmem>>, vector<8x16x16xf32>
    %4 = arith.maximumf %2, %3 : vector<8x16x16xf32>
    %c0_6 = arith.constant 0 : index
    %c1_7 = arith.constant 1 : index
    %c0_8 = arith.constant 0 : index
    %5 = vector.load %arg2[%c0_6, %c1_7, %c0_8] : memref<8x18x18xf32, #tpu.memory_space<vmem>>, vector<8x16x16xf32>
    %6 = arith.maximumf %4, %5 : vector<8x16x16xf32>
    %c0_9 = arith.constant 0 : index
    %c1_10 = arith.constant 1 : index
    %c1_11 = arith.constant 1 : index
    %7 = vector.load %arg2[%c0_9, %c1_10, %c1_11] : memref<8x18x18xf32, #tpu.memory_space<vmem>>, vector<8x16x16xf32>
    %8 = arith.maximumf %6, %7 : vector<8x16x16xf32>
    %c0_12 = arith.constant 0 : index
    %c1_13 = arith.constant 1 : index
    %c2_14 = arith.constant 2 : index
    %9 = vector.load %arg2[%c0_12, %c1_13, %c2_14] : memref<8x18x18xf32, #tpu.memory_space<vmem>>, vector<8x16x16xf32>
    %10 = arith.maximumf %8, %9 : vector<8x16x16xf32>
    %c0_15 = arith.constant 0 : index
    %c2_16 = arith.constant 2 : index
    %c0_17 = arith.constant 0 : index
    %11 = vector.load %arg2[%c0_15, %c2_16, %c0_17] : memref<8x18x18xf32, #tpu.memory_space<vmem>>, vector<8x16x16xf32>
    %12 = arith.maximumf %10, %11 : vector<8x16x16xf32>
    %c0_18 = arith.constant 0 : index
    %c2_19 = arith.constant 2 : index
    %c1_20 = arith.constant 1 : index
    %13 = vector.load %arg2[%c0_18, %c2_19, %c1_20] : memref<8x18x18xf32, #tpu.memory_space<vmem>>, vector<8x16x16xf32>
    %14 = arith.maximumf %12, %13 : vector<8x16x16xf32>
    %c0_21 = arith.constant 0 : index
    %c2_22 = arith.constant 2 : index
    %c2_23 = arith.constant 2 : index
    %15 = vector.load %arg2[%c0_21, %c2_22, %c2_23] : memref<8x18x18xf32, #tpu.memory_space<vmem>>, vector<8x16x16xf32>
    %16 = arith.maximumf %14, %15 : vector<8x16x16xf32>
    %cst = arith.constant 1.000000e+00 : f32
    %17 = vector.broadcast %cst : f32 to vector<8x16x16xf32>
    %18 = arith.subf %17, %16 : vector<8x16x16xf32>
    %cst_24 = arith.constant dense<0.000000e+00> : vector<8x16xf32>
    %19 = vector.multi_reduction <add>, %18, %cst_24 [2] : vector<8x16x16xf32> to vector<8x16xf32>
    %20 = vector.shape_cast %19 : vector<8x16xf32> to vector<8x16x1xf32>
    %cst_25 = arith.constant dense<0.000000e+00> : vector<8x1xf32>
    %21 = vector.multi_reduction <add>, %20, %cst_25 [1] : vector<8x16x1xf32> to vector<8x1xf32>
    %22 = vector.shape_cast %21 : vector<8x1xf32> to vector<8x1x1xf32>
    %cst_26 = arith.constant dense<0.000000e+00> : vector<1x1xf32>
    %23 = vector.multi_reduction <add>, %22, %cst_26 [0] : vector<8x1x1xf32> to vector<1x1xf32>
    %24 = vector.shape_cast %23 : vector<1x1xf32> to vector<1x1x1xf32>
    %cst_27 = arith.constant 2.048000e+03 : f32
    %25 = vector.broadcast %cst_27 : f32 to vector<1x1x1xf32>
    %26 = arith.divf %25, %24 : vector<1x1x1xf32>
    %c0_28 = arith.constant 0 : index
    %c0_29 = arith.constant 0 : index
    %c0_30 = arith.constant 0 : index
    %27 = vector.load %arg1[%c0_28, %c0_29, %c0_30] : memref<8x16x16xf32, #tpu.memory_space<vmem>>, vector<8x16x16xf32>
    %28 = arith.mulf %27, %18 : vector<8x16x16xf32>
    %29 = vector.broadcast %26 : vector<1x1x1xf32> to vector<8x16x16xf32>
    %30 = arith.mulf %28, %29 : vector<8x16x16xf32>
    %c0_31 = arith.constant 0 : index
    %c0_32 = arith.constant 0 : index
    %c0_33 = arith.constant 0 : index
    %31 = vector.load %arg3[%c0_31, %c0_32, %c0_33] : memref<8x16x16xf32, #tpu.memory_space<vmem>>, vector<8x16x16xf32>
    tpu.vector_store %arg3[%c0_31, %c0_32, %c0_33], %30 {strides = array<i32>} : memref<8x16x16xf32, #tpu.memory_space<vmem>>, vector<8x16x16xf32>,
    return
  }
  func.func @transform_0(%arg0: i32) -> (i32, i32, i32) {
    %c0_i32 = arith.constant 0 : i32
    %c0_i32_0 = arith.constant 0 : i32
    %c0_i32_1 = arith.constant 0 : i32
    %c0_i32_2 = arith.constant 0 : i32
    return %c0_i32, %c0_i32_0, %c0_i32_1 : i32, i32, i32
  }
  func.func @transform_1(%arg0: i32) -> (i32, i32, i32) {
    %c0_i32 = arith.constant 0 : i32
    %c0_i32_0 = arith.constant 0 : i32
    %c0_i32_1 = arith.constant 0 : i32
    %c0_i32_2 = arith.constant 0 : i32
    return %c0_i32, %c0_i32_0, %c0_i32_1 : i32, i32, i32
  }
  func.func @transform_2(%arg0: i32) -> (i32, i32, i32) {
    %c0_i32 = arith.constant 0 : i32
    %c0_i32_0 = arith.constant 0 : i32
    %c0_i32_1 = arith.constant 0 : i32
    %c0_i32_2 = arith.constant 0 : i32
    return %c0_i32, %c0_i32_0, %c0_i32_1 : i32, i32, i32
  }
}

</mosaic_0001>

<bundles_post_ra>
// kernel: tpu_custom_call.1
= control target key start
LH: loop header
LB: loop body
LE: loop exit
PB: predicated region body
PF: predicated region fallthrough
CT: control target
= control target key end

     0   :  { %s765_s13 = smov 127   ;;  %s1644_s0 = inlined_call_operand.vmem [shape: f32[8,16,16], index: 0, kind: input, shape index: {}]   ;;  %s1645_s1 = inlined_call_operand.vmem [shape: f32[8,18,18], index: 1, kind: input, shape index: {}]   ;;  %s1646_s2 = inlined_call_operand.hbm [shape: f32[8,16,16], index: 2, kind: output, shape index: {}]  }
   0x1   :  { %v788_v0 = vld [vmem:[%s1645_s1 + $0x18] sm:$0xff]  ;;  %v793_v1 = vld [vmem:[%s1645_s1] sm:$0xff]  ;;  %v807_v3 = vld [vmem:[%s1645_s1 + $0x8] sm:$0xff] }
   0x2   :  { %48 = vrot.lane.b32.xlu1 %v788_v0, %s765_s13  ;;  %44 = vrot.lane.b32.xlu0 %v793_v1, %s765_s13  ;;  %v802_v2 = vld [vmem:[%s1645_s1 + $0x20] sm:$0xff]  ;;  %v816_v4 = vld [vmem:[%s1645_s1 + $0x38] sm:$0xff] }
   0x3   :  { %v821_v5 = vld [vmem:[%s1645_s1 + $0x30] sm:$0xff]  ;;  %v835_v7 = vld [vmem:[%s1645_s1 + $0x48] sm:$0xff]  ;;  %v849_v9 = vld [vmem:[%s1645_s1 + $0x60] sm:$0xff] }
   0x4   :  { %v830_v6 = vld [vmem:[%s1645_s1 + $0x50] sm:$0xff]  ;;  %v844_v8 = vld [vmem:[%s1645_s1 + $0x68] sm:$0xff] }
   0x6   :  { %50 = vrot.lane.b32.xlu1 %v802_v2, %s765_s13  ;;  %46 = vrot.lane.b32.xlu0 %v807_v3, %s765_s13 }
   0xa   :  { %54 = vrot.lane.b32.xlu1 %v816_v4, %s765_s13  ;;  %52 = vrot.lane.b32.xlu0 %v821_v5, %s765_s13 }
   0xe   :  { %58 = vrot.lane.b32.xlu1 %v830_v6, %s765_s13  ;;  %56 = vrot.lane.b32.xlu0 %v835_v7, %s765_s13 }
   0xf   :  { %7 = vsyncpa [#allocation3], 0  ;;  %v858_v10 = vld [vmem:[%s1645_s1 + $0x80] sm:$0xff]  ;;  %v863_v11 = vld [vmem:[%s1645_s1 + $0x78] sm:$0xff]  ;;  %s766_s15 = smov 126   ;;  %vm540_vm0 = vcmask 130048  }
  0x10   :  { %1663 = vst [vmem:[#allocation5_spill] sm:$0xff] %v863_v11  ;;  %v872_v12 = vld [vmem:[%s1645_s1 + $0x98] sm:$0xff]  ;;  %v877_v13 = vld [vmem:[%s1645_s1 + $0x90] sm:$0xff]  ;;  %v891_v15 = vld [vmem:[%s1645_s1 + $0xa8] sm:$0xff] }
  0x11   :  { %1664 = vst [vmem:[#allocation6_spill] sm:$0xff] %v877_v13  ;;  %v886_v14 = vld [vmem:[%s1645_s1 + $0xb0] sm:$0xff]  ;;  %1665 = vst [vmem:[#allocation7_spill] sm:$0xff] %v891_v15  ;;  %v925_v17 = vld [vmem:[%s1645_s1 + $0x1] sm:$0xff] }
  0x12   :  { %62 = vrot.lane.b32.xlu1 %v844_v8, %s765_s13  ;;  %60 = vrot.lane.b32.xlu0 %v849_v9, %s765_s13  ;;  %v920_v16 = vld [vmem:[%s1645_s1 + $0x9] sm:$0xff]  ;;  %v934_v18 = vld [vmem:[%s1645_s1 + $0x21] sm:$0xff] }
  0x13   :  { %v939_v19 = vld [vmem:[%s1645_s1 + $0x19] sm:$0xff]  ;;  %v953_v21 = vld [vmem:[%s1645_s1 + $0x31] sm:$0xff]  ;;  %v979_v23 = vld [vmem:[%s1645_s1 + $0x49] sm:$0xff] }
  0x14   :  { %v948_v20 = vld [vmem:[%s1645_s1 + $0x39] sm:$0xff]  ;;  %v974_v22 = vld [vmem:[%s1645_s1 + $0x51] sm:$0xff]  ;;  %v996_v24 = vld [vmem:[%s1645_s1 + $0x69] sm:$0xff] }
  0x15   :  { %v1001_v25 = vld [vmem:[%s1645_s1 + $0x61] sm:$0xff]  ;;  %v1014_v26 = vld [vmem:[%s1645_s1 + $0xa] sm:$0xff]  ;;  %v1051_v31 = vld [vmem:[%s1645_s1 + $0x79] sm:$0xff] }
  0x16   :  { %66 = vrot.lane.b32.xlu1 %v858_v10, %s765_s13  ;;  %64 = vrot.lane.b32.xlu0 %v863_v11, %s765_s13  ;;  %v1019_v27 = vld [vmem:[%s1645_s1 + $0x2] sm:$0xff]  ;;  %v1033_v29 = vld [vmem:[%s1645_s1 + $0x1a] sm:$0xff]  ;;  %1667 = vst [vmem:[#allocation9_spill] sm:$0xff] %v1051_v31 }
  0x17   :  { %v1028_v28 = vld [vmem:[%s1645_s1 + $0x22] sm:$0xff]  ;;  %v1064_v32 = vld [vmem:[%s1645_s1 + $0x3a] sm:$0xff]  ;;  %v1069_v33 = vld [vmem:[%s1645_s1 + $0x32] sm:$0xff] }
  0x18   :  { %v1046_v30 = vld [vmem:[%s1645_s1 + $0x81] sm:$0xff]  ;;  %v1096_v40 = vld [vmem:[%s1645_s1 + $0x99] sm:$0xff]  ;;  %v1101_v41 = vld [vmem:[%s1645_s1 + $0x91] sm:$0xff] }
  0x19   :  { %1666 = vst [vmem:[#allocation8_spill] sm:$0xff] %v1046_v30  ;;  %1668 = vst [vmem:[#allocation10_spill] sm:$0xff] %v1096_v40  ;;  %v1122_v46 = vld [vmem:[%s1645_s1 + $0x52] sm:$0xff]  ;;  %v1127_v47 = vld [vmem:[%s1645_s1 + $0x4a] sm:$0xff] }
  0x1a   :  { %70 = vrot.lane.b32.xlu1 %v872_v12, %s765_s13  ;;  %68 = vrot.lane.b32.xlu0 %v877_v13, %s765_s13  ;;  %1669 = vst [vmem:[#allocation11_spill] sm:$0xff] %v1101_v41  ;;  %v1148_v52 = vld [vmem:[%s1645_s1 + $0xb1] sm:$0xff]  ;;  %v1153_v53 = vld [vmem:[%s1645_s1 + $0xa9] sm:$0xff] }
  0x1b   :  { %1672 = vst [vmem:[#allocation14_spill] sm:$0xff] %v1148_v52  ;;  %1673 = vst [vmem:[#allocation15_spill] sm:$0xff] %v1153_v53  ;;  %v1174_v58 = vld [vmem:[%s1645_s1 + $0x6a] sm:$0xff]  ;;  %v1179_v59 = vld [vmem:[%s1645_s1 + $0x62] sm:$0xff] }
  0x1e   :  { %74 = vrot.lane.b32.xlu1 %v886_v14, %s765_s13  ;;  %72 = vrot.lane.b32.xlu0 %v891_v15, %s765_s13 }
  0x22   :  { %110 = vrot.lane.b32.xlu1 %v807_v3, %s766_s15  ;;  %108 = vrot.lane.b32.xlu0 %v793_v1, %s766_s15 }
  0x26   :  { %114 = vrot.lane.b32.xlu1 %v802_v2, %s766_s15  ;;  %112 = vrot.lane.b32.xlu0 %v788_v0, %s766_s15 }
  0x2a   :  { %118 = vrot.lane.b32.xlu1 %v816_v4, %s766_s15  ;;  %116 = vrot.lane.b32.xlu0 %v821_v5, %s766_s15 }
  0x2e   :  { %122 = vrot.lane.b32.xlu1 %v830_v6, %s766_s15  ;;  %120 = vrot.lane.b32.xlu0 %v835_v7, %s766_s15 }
  0x32   :  { %126 = vrot.lane.b32.xlu1 %v844_v8, %s766_s15  ;;  %124 = vrot.lane.b32.xlu0 %v849_v9, %s766_s15 }
  0x36   :  { %222 = vrot.lane.b32.xlu1 %v920_v16, %s765_s13  ;;  %220 = vrot.lane.b32.xlu0 %v925_v17, %s765_s13 }
  0x3a   :  { %226 = vrot.lane.b32.xlu1 %v934_v18, %s765_s13  ;;  %224 = vrot.lane.b32.xlu0 %v939_v19, %s765_s13 }
  0x3e   :  { %230 = vrot.lane.b32.xlu1 %v948_v20, %s765_s13  ;;  %228 = vrot.lane.b32.xlu0 %v953_v21, %s765_s13 }
  0x42   :  { %286 = vrot.lane.b32.xlu1 %v920_v16, %s766_s15  ;;  %284 = vrot.lane.b32.xlu0 %v925_v17, %s766_s15 }
  0x46   :  { %290 = vrot.lane.b32.xlu1 %v934_v18, %s766_s15  ;;  %288 = vrot.lane.b32.xlu0 %v939_v19, %s766_s15 }
  0x4a   :  { %130 = vrot.lane.b32.xlu1 %v858_v10, %s766_s15  ;;  %128 = vrot.lane.b32.xlu0 %v863_v11, %s766_s15 }
  0x4e   :  { %234 = vrot.lane.b32.xlu1 %v974_v22, %s765_s13  ;;  %232 = vrot.lane.b32.xlu0 %v979_v23, %s765_s13 }
  0x52   :  { %294 = vrot.lane.b32.xlu1 %v948_v20, %s766_s15  ;;  %292 = vrot.lane.b32.xlu0 %v953_v21, %s766_s15 }
  0x56   :  { %134 = vrot.lane.b32.xlu1 %v872_v12, %s766_s15  ;;  %132 = vrot.lane.b32.xlu0 %v877_v13, %s766_s15 }
  0x5a   :  { %238 = vrot.lane.b32.xlu1 %v996_v24, %s765_s13  ;;  %236 = vrot.lane.b32.xlu0 %v1001_v25, %s765_s13 }
  0x5e   :  { %298 = vrot.lane.b32.xlu1 %v974_v22, %s766_s15  ;;  %296 = vrot.lane.b32.xlu0 %v979_v23, %s766_s15 }
  0x62   :  { %398 = vrot.lane.b32.xlu1 %v1014_v26, %s765_s13  ;;  %396 = vrot.lane.b32.xlu0 %v1019_v27, %s765_s13 }
  0x66   :  { %402 = vrot.lane.b32.xlu1 %v1028_v28, %s765_s13  ;;  %400 = vrot.lane.b32.xlu0 %v1033_v29, %s765_s13 }
  0x6a   :  { %138 = vrot.lane.b32.xlu1 %v886_v14, %s766_s15  ;;  %136 = vrot.lane.b32.xlu0 %v891_v15, %s766_s15  ;;  %v1198_v15 = vld [vmem:[%s1645_s1 + $0x82] sm:$0xff] }
  0x6b   :  { %1675 = vst [vmem:[#allocation17_spill] sm:$0xff] %v1198_v15 }
  0x6e   :  { %242 = vrot.lane.b32.xlu1 %v1046_v30, %s765_s13  ;;  %240 = vrot.lane.b32.xlu0 %v1051_v31, %s765_s13 }
  0x72   :  { %302 = vrot.lane.b32.xlu1 %v996_v24, %s766_s15  ;;  %300 = vrot.lane.b32.xlu0 %v1001_v25, %s766_s15 }
  0x74   :  { %v1071_v34 = vpop.permute.xlu1 %48  ;;  %v1073_v35 = vpop.permute.xlu0 %44 }
  0x76   :  { %406 = vrot.lane.b32.xlu1 %v1064_v32, %s765_s13  ;;  %404 = vrot.lane.b32.xlu0 %v1069_v33, %s765_s13 }
  0x78   :  { %v51_v36 = vpop.permute.xlu1 %50  ;;  %v1079_v37 = vpop.permute.xlu0 %46 }
  0x7a   :  { %462 = vrot.lane.b32.xlu1 %v1014_v26, %s766_s15  ;;  %460 = vrot.lane.b32.xlu0 %v1019_v27, %s766_s15 }
  0x7c   :  { %v1085_v38 = vpop.permute.xlu1 %54  ;;  %v1087_v39 = vpop.permute.xlu0 %52 }
  0x7d   :  { %v97_v11 = vmax.f32 %v816_v4, %v1085_v38  ;;  %v1231_v4 = vld [vmem:[%s1645_s1 + $0x92] sm:$0xff] }
  0x7e   :  { %466 = vrot.lane.b32.xlu1 %v1028_v28, %s766_s15  ;;  %464 = vrot.lane.b32.xlu0 %v1033_v29, %s766_s15  ;;  %1678 = vst [vmem:[#allocation20_spill] sm:$0xff] %v1231_v4 }
  0x80   :  { %v1103_v42 = vpop.permute.xlu1 %58  ;;  %v1105_v43 = vpop.permute.xlu0 %56 }
  0x82   :  { %246 = vrot.lane.b32.xlu1 %v1096_v40, %s765_s13  ;;  %244 = vrot.lane.b32.xlu0 %v1101_v41, %s765_s13 }
  0x84   :  { %v1111_v44 = vpop.permute.xlu1 %62  ;;  %v1113_v45 = vpop.permute.xlu0 %60 }
  0x86   :  { %306 = vrot.lane.b32.xlu1 %v1046_v30, %s766_s15  ;;  %304 = vrot.lane.b32.xlu0 %v1051_v31, %s766_s15  ;;  %v95_v31 = vmax.f32 %v802_v2, %v51_v36 }
  0x88   :  { %v1129_v48 = vpop.permute.xlu1 %66  ;;  %v1131_v49 = vpop.permute.xlu0 %64 }
  0x89   :  { %1670 = vst [vmem:[#allocation12_spill] sm:$0xff] %v1131_v49  ;;  %v96_v49 = vmax.f32 %v821_v5, %v1087_v39 }
  0x8a   :  { %410 = vrot.lane.b32.xlu1 %v1122_v46, %s765_s13  ;;  %408 = vrot.lane.b32.xlu0 %v1127_v47, %s765_s13 }
  0x8c   :  { %v1137_v50 = vpop.permute.xlu1 %70  ;;  %v1139_v51 = vpop.permute.xlu0 %68 }
  0x8d   :  { %1671 = vst [vmem:[#allocation13_spill] sm:$0xff] %v1139_v51 }
  0x8e   :  { %470 = vrot.lane.b32.xlu1 %v1064_v32, %s766_s15  ;;  %468 = vrot.lane.b32.xlu0 %v1069_v33, %s766_s15 }
  0x90   :  { %v1155_v54 = vpop.permute.xlu1 %74  ;;  %v1157_v55 = vpop.permute.xlu0 %72 }
  0x91   :  { %1674 = vst [vmem:[#allocation16_spill] sm:$0xff] %v1157_v55  ;;  %v1203_v55 = vld [vmem:[%s1645_s1 + $0x7a] sm:$0xff] }
  0x92   :  { %250 = vrot.lane.b32.xlu1 %v1148_v52, %s765_s13  ;;  %248 = vrot.lane.b32.xlu0 %v1153_v53, %s765_s13  ;;  %1676 = vst [vmem:[#allocation18_spill] sm:$0xff] %v1203_v55 }
  0x94   :  { %v1163_v56 = vpop.permute.xlu1 %110  ;;  %v1165_v57 = vpop.permute.xlu0 %108 }
  0x96   :  { %310 = vrot.lane.b32.xlu1 %v1096_v40, %s766_s15  ;;  %308 = vrot.lane.b32.xlu0 %v1101_v41, %s766_s15 }
  0x98   :  { %v115_v60 = vpop.permute.xlu1 %114  ;;  %v1181_v61 = vpop.permute.xlu0 %112 }
  0x9a   :  { %414 = vrot.lane.b32.xlu1 %v1174_v58, %s765_s13  ;;  %412 = vrot.lane.b32.xlu0 %v1179_v59, %s765_s13 }
  0x9c   :  { %v119_v62 = vpop.permute.xlu1 %118  ;;  %v117_v63 = vpop.permute.xlu0 %116 }
  0x9d   :  { %v161_v2 = vmax.f32 %v97_v11, %v119_v62  ;;  %v160_v36 = vmax.f32 %v96_v49, %v117_v63 }
  0x9e   :  { %474 = vrot.lane.b32.xlu1 %v1122_v46, %s766_s15  ;;  %472 = vrot.lane.b32.xlu0 %v1127_v47, %s766_s15 }
  0x9f   :  { %v193_v11 = vmax.f32 %v161_v2, %v948_v20  ;;  %v1259_v20 = vld [vmem:[%s1645_s1 + $0xaa] sm:$0xff] }
  0xa0   :  { %v123_v41 = vpop.permute.xlu1 %122  ;;  %v121_v40 = vpop.permute.xlu0 %120  ;;  %1680 = vst [vmem:[#allocation22_spill] sm:$0xff] %v1259_v20 }
  0xa2   :  { %314 = vrot.lane.b32.xlu1 %v1148_v52, %s766_s15  ;;  %312 = vrot.lane.b32.xlu0 %v1153_v53, %s766_s15  ;;  %v159_v53 = vmax.f32 %v95_v31, %v115_v60  ;;  %v1226_v60 = vld [vmem:[%s1645_s1 + $0x9a] sm:$0xff] }
  0xa3   :  { %1677 = vst [vmem:[#allocation19_spill] sm:$0xff] %v1226_v60 }
  0xa4   :  { %v127_v13 = vpop.permute.xlu1 %126  ;;  %v125_v51 = vpop.permute.xlu0 %124  ;;  %v191_v31 = vmax.f32 %v159_v53, %v934_v18  ;;  %v192_v18 = vmax.f32 %v160_v36, %v953_v21 }
  0xa6   :  { %418 = vrot.lane.b32.xlu1 %v1198_v15, %s765_s13  ;;  %416 = vrot.lane.b32.xlu0 %v1203_v55, %s765_s13 }
  0xa8   :  { %v1210_v52 = vpop.permute.xlu1 %222  ;;  %v1212_v30 = vpop.permute.xlu0 %220 }
  0xaa   :  { %478 = vrot.lane.b32.xlu1 %v1174_v58, %s766_s15  ;;  %476 = vrot.lane.b32.xlu0 %v1179_v59, %s766_s15 }
  0xac   :  { %v227_v5 = vpop.permute.xlu1 %226  ;;  %v1233_v38 = vpop.permute.xlu0 %224 }
  0xad   :  { %v1235_v39 = vmax.f32 %v191_v31, %v227_v5  ;;  %v1254_v31 = vld [vmem:[%s1645_s1 + $0xb2] sm:$0xff] }
  0xae   :  { %422 = vrot.lane.b32.xlu1 %v1226_v60, %s765_s13  ;;  %420 = vrot.lane.b32.xlu0 %v1231_v4, %s765_s13  ;;  %1679 = vst [vmem:[#allocation21_spill] sm:$0xff] %v1254_v31 }
  0xb0   :  { %v231_v49 = vpop.permute.xlu1 %230  ;;  %v229_v53 = vpop.permute.xlu0 %228 }
  0xb1   :  { %v1243_v62 = vmax.f32 %v193_v11, %v231_v49  ;;  %v1245_v63 = vmax.f32 %v192_v18, %v229_v53  ;;  %v99_v11 = vmax.f32 %v830_v6, %v1103_v42  ;;  %v98_v18 = vmax.f32 %v835_v7, %v1105_v43 }
  0xb2   :  { %482 = vrot.lane.b32.xlu1 %v1198_v15, %s766_s15  ;;  %480 = vrot.lane.b32.xlu0 %v1203_v55, %s766_s15 }
  0xb3   :  { %v163_v49 = vmax.f32 %v99_v11, %v123_v41  ;;  %v162_v53 = vmax.f32 %v98_v18, %v121_v40  ;;  %v101_v18 = vmax.f32 %v844_v8, %v1111_v44 }
  0xb4   :  { %v1261_v21 = vpop.permute.xlu1 %286  ;;  %v1263_v2 = vpop.permute.xlu0 %284 }
  0xb5   :  { %v195_v6 = vmax.f32 %v163_v49, %v974_v22  ;;  %v194_v7 = vmax.f32 %v162_v53, %v979_v23  ;;  %v105_v22 = vmax.f32 %v872_v12, %v1137_v50  ;;  %v165_v23 = vmax.f32 %v101_v18, %v127_v13 }
  0xb6   :  { %426 = vrot.lane.b32.xlu1 %v1254_v31, %s765_s13  ;;  %424 = vrot.lane.b32.xlu0 %v1259_v20, %s765_s13 }
  0xb8   :  { %v1269_v36 = vpop.permute.xlu1 %290  ;;  %v1271_v5 = vpop.permute.xlu0 %288 }
  0xba   :  { %486 = vrot.lane.b32.xlu1 %v1226_v60, %s766_s15  ;;  %484 = vrot.lane.b32.xlu0 %v1231_v4, %s766_s15 }
  0xbc   :  { %v1281_v55 = vpop.permute.xlu1 %130  ;;  %v1283_v15 = vpop.permute.xlu0 %128 }
  0xbe   :  { %490 = vrot.lane.b32.xlu1 %v1254_v31, %s766_s15  ;;  %488 = vrot.lane.b32.xlu0 %v1259_v20, %s766_s15  ;;  %v100_v20 = vmax.f32 %v849_v9, %v1113_v45 }
  0xc0   :  { %v235_v42 = vpop.permute.xlu1 %234  ;;  %v233_v43 = vpop.permute.xlu0 %232  ;;  %v164_v49 = vmax.f32 %v100_v20, %v125_v51  ;;  %v92_v20 = vmax.f32 %v793_v1, %v1073_v35 }
  0xc1   :  { %v1291_v60 = vmax.f32 %v195_v6, %v235_v42  ;;  %v1293_v41 = vmax.f32 %v194_v7, %v233_v43  ;;  %v197_v42 = vmax.f32 %v165_v23, %v996_v24  ;;  %v93_v24 = vmax.f32 %v807_v3, %v1079_v37 }
  0xc2   :  { %v196_v43 = vmax.f32 %v164_v49, %v1001_v25  ;;  %v107_v25 = vmax.f32 %v886_v14, %v1155_v54  ;;  %v94_v49 = vmax.f32 %v788_v0, %v1071_v34 }
  0xc3   :  { %v157_v18 = vmax.f32 %v93_v24, %v1163_v56 }
  0xc4   :  { %v1295_v40 = vpop.permute.xlu1 %294  ;;  %v1297_v11 = vpop.permute.xlu0 %292  ;;  %v158_v3 = vmax.f32 %v94_v49, %v1181_v61 }
  0xc5   :  { %v189_v14 = vmax.f32 %v157_v18, %v920_v16 }
  0xc6   :  { %v190_v0 = vmax.f32 %v158_v3, %v939_v19 }
  0xc7   :  { %v269_v37 = vmax.f32 %v189_v14, %v1210_v52 }
  0xc8   :  { %v135_v53 = vpop.permute.xlu1 %134  ;;  %v1305_v6 = vpop.permute.xlu0 %132  ;;  %v270_v61 = vmax.f32 %v190_v0, %v1233_v38  ;;  %v336_v0 = vmax.f32 %v1245_v63, %v1297_v11 }
  0xc9   :  { %v1307_v7 = vmax.f32 %v105_v22, %v135_v53  ;;  %v156_v22 = vmax.f32 %v92_v20, %v1165_v57  ;;  %v333_v34 = vmax.f32 %v269_v37, %v1261_v21  ;;  %v335_v20 = vmax.f32 %v1235_v39, %v1269_v36 }
  0xcb   :  { %v188_v35 = vmax.f32 %v156_v22, %v925_v17  ;;  %v334_v17 = vmax.f32 %v270_v61, %v1271_v5  ;;  %v365_v52 = vmax.f32 %v333_v34, %v1014_v26  ;;  %v367_v18 = vmax.f32 %v335_v20, %v1028_v28 }
  0xcc   :  { %v239_v31 = vpop.permute.xlu1 %238  ;;  %v237_v4 = vpop.permute.xlu0 %236 }
  0xcd   :  { %v1311_v8 = vmax.f32 %v197_v42, %v239_v31  ;;  %v1313_v44 = vmax.f32 %v196_v43, %v237_v4  ;;  %v268_v54 = vmax.f32 %v188_v35, %v1212_v30  ;;  %v366_v21 = vmax.f32 %v334_v17, %v1033_v29 }
  0xcf   :  { %v332_v42 = vmax.f32 %v268_v54, %v1263_v2  ;;  %v337_v54 = vmax.f32 %v1243_v62, %v1295_v40 }
  0xd0   :  { %v1315_v9 = vpop.permute.xlu1 %298  ;;  %v1317_v12 = vpop.permute.xlu0 %296 }
  0xd1   :  { %v364_v30 = vmax.f32 %v332_v42, %v1019_v27  ;;  %v369_v17 = vmax.f32 %v337_v54, %v1064_v32 }
  0xd4   :  { %v399_v13 = vpop.permute.xlu1 %398  ;;  %v397_v45 = vpop.permute.xlu0 %396 }
  0xd5   :  { %v445_v24 = vmax.f32 %v365_v52, %v399_v13  ;;  %v368_v52 = vmax.f32 %v336_v0, %v1069_v33 }
  0xd8   :  { %v403_v50 = vpop.permute.xlu1 %402  ;;  %v401_v51 = vpop.permute.xlu0 %400 }
  0xd9   :  { %v446_v5 = vmax.f32 %v366_v21, %v401_v51  ;;  %v447_v22 = vmax.f32 %v367_v18, %v403_v50  ;;  %v339_v21 = vmax.f32 %v1291_v60, %v1315_v9  ;;  %v338_v18 = vmax.f32 %v1293_v41, %v1317_v12  ;;  %v1681_v9 = vld [vmem:[#allocation12_spill] sm:$0xff] }
  0xda   :  { %v103_v60 = vmax.f32 %v858_v10, %v1129_v48 }
  0xdc   :  { %v139_v31 = vpop.permute.xlu1 %138  ;;  %v1325_v4 = vpop.permute.xlu0 %136 }
  0xdd   :  { %v1329_v23 = vmax.f32 %v107_v25, %v139_v31  ;;  %v444_v25 = vmax.f32 %v364_v30, %v397_v45 }
  0xe0   :  { %v1333_v53 = vpop.permute.xlu1 %242  ;;  %v1335_v1 = vpop.permute.xlu0 %240 }
  0xe4   :  { %v1342_v56 = vpop.permute.xlu1 %302  ;;  %v1344_v57 = vpop.permute.xlu0 %300 }
  0xe5   :  { %v340_v10 = vmax.f32 %v1313_v44, %v1344_v57  ;;  %v1686_v57 = vld [vmem:[#allocation6_spill] sm:$0xff] }
  0xe7   :  { %v372_v44 = vmax.f32 %v340_v10, %v1179_v59  ;;  %v1691_v10 = vld [vmem:[#allocation17_spill] sm:$0xff] }
  0xe8   :  { %v407_v43 = vpop.permute.xlu1 %406  ;;  %v405_v16 = vpop.permute.xlu0 %404 }
  0xe9   :  { %v449_v30 = vmax.f32 %v369_v17, %v407_v43  ;;  %v448_v20 = vmax.f32 %v368_v52, %v405_v16  ;;  %v1682_v17 = vld [vmem:[#allocation5_spill] sm:$0xff] }
  0xea   :  { %v102_v41 = vmax.f32 %v1682_v17, %v1681_v9  ;;  %v1687_v17 = vld [vmem:[#allocation16_spill] sm:$0xff] }
  0xec   :  { %v463_v19 = vpop.permute.xlu1 %462  ;;  %v461_v31 = vpop.permute.xlu0 %460 }
  0xed   :  { %v1356_v2 = vmax.f32 %v445_v24, %v463_v19  ;;  %v1358_v38 = vmax.f32 %v444_v25, %v461_v31 }
  0xef   :  { %v525_v26 = vsub.f32 1.0, %v1356_v2  ;;  %v524_v27 = vsub.f32 1.0, %v1358_v38  ;;  %v668_v38 = vld [vmem:[%s1644_s0 + $0x70] sm:$0xff] }
  0xf0   :  { %v467_v39 = vpop.permute.xlu1 %466  ;;  %v465_v36 = vpop.permute.xlu0 %464 }
  0xf1   :  { %v1363_v13 = vmax.f32 %v446_v5, %v465_v36  ;;  %v1365_v45 = vmax.f32 %v447_v22, %v467_v39  ;;  %v544_v29 = vsel %vm540_vm0, %v525_v26, 0.0  ;;  %v541_v28 = vsel %vm540_vm0, %v524_v27, 0.0 }
  0xf2   :  { %545 = vadd.xlane.f32.xlu1 %v544_v29  ;;  %542 = vadd.xlane.f32.xlu0 %v541_v28  ;;  %v371_v39 = vmax.f32 %v339_v21, %v1122_v46  ;;  %v370_v36 = vmax.f32 %v338_v18, %v1127_v47 }
  0xf3   :  { %v526_v51 = vsub.f32 1.0, %v1363_v13  ;;  %v527_v3 = vsub.f32 1.0, %v1365_v45 }
  0xf4   :  { %v1374_v49 = vpop.permute.xlu1 %246  ;;  %v1376_v50 = vpop.permute.xlu0 %244 }
  0xf5   :  { %v547_v14 = vsel %vm540_vm0, %v526_v51, 0.0  ;;  %v550_v34 = vsel %vm540_vm0, %v527_v3, 0.0 }
  0xf6   :  { %548 = vadd.xlane.f32.xlu0 %v547_v14 }
  0xf8   :  { %v1382_v35 = vpop.permute.xlu1 %306  ;;  %v1384_v37 = vpop.permute.xlu0 %304 }
  0xfa   :  { %551 = vadd.xlane.f32.xlu0 %v550_v34 }
  0xfc   :  { %v411_v42 = vpop.permute.xlu1 %410  ;;  %v409_v61 = vpop.permute.xlu0 %408 }
  0xfd   :  { %v451_v29 = vmax.f32 %v371_v39, %v411_v42  ;;  %v450_v28 = vmax.f32 %v370_v36, %v409_v61  ;;  %v167_v42 = vmax.f32 %v103_v60, %v1281_v55  ;;  %v166_v61 = vmax.f32 %v102_v41, %v1283_v15  ;;  %v1688_v41 = vld [vmem:[#allocation7_spill] sm:$0xff] }
 0x100   :  { %v471_v24 = vpop.permute.xlu1 %470  ;;  %v469_v25 = vpop.permute.xlu0 %468 }
 0x101   :  { %v1395_v19 = vmax.f32 %v449_v30, %v471_v24  ;;  %v1397_v62 = vmax.f32 %v448_v20, %v469_v25  ;;  %v341_v30 = vmax.f32 %v1311_v8, %v1342_v56  ;;  %v1683_v25 = vld [vmem:[#allocation8_spill] sm:$0xff]  ;;  %v1685_v56 = vld [vmem:[#allocation13_spill] sm:$0xff] }
 0x102   :  { %v199_v15 = vmax.f32 %v167_v42, %v1683_v25  ;;  %v104_v21 = vmax.f32 %v1686_v57, %v1685_v56  ;;  %v106_v42 = vmax.f32 %v1688_v41, %v1687_v17  ;;  %v1694_v57 = vld [vmem:[#allocation15_spill] sm:$0xff]  ;;  %v1696_v17 = vld [vmem:[#allocation20_spill] sm:$0xff] }
 0x103   :  { %v529_v63 = vsub.f32 1.0, %v1395_v19  ;;  %v528_v40 = vsub.f32 1.0, %v1397_v62  ;;  %v373_v8 = vmax.f32 %v341_v30, %v1174_v58  ;;  %v1690_v30 = vld [vmem:[#allocation11_spill] sm:$0xff] }
 0x104   :  { %v1401_v11 = vpop.permute.xlu1 %250  ;;  %v1403_v31 = vpop.permute.xlu0 %248  ;;  %v279_v18 = vmax.f32 %v199_v15, %v1333_v53 }
 0x105   :  { %v556_v32 = vsel %vm540_vm0, %v529_v63, 0.0  ;;  %v553_v33 = vsel %vm540_vm0, %v528_v40, 0.0 }
 0x106   :  { %557 = vadd.xlane.f32.xlu0 %v556_v32  ;;  %554 = vadd.xlane.f32.xlu1 %v553_v33  ;;  %v1684_v32 = vld [vmem:[#allocation9_spill] sm:$0xff]  ;;  %v343_v60 = vmax.f32 %v279_v18, %v1382_v35 }
 0x107   :  { %v198_v33 = vmax.f32 %v166_v61, %v1684_v32 }
 0x108   :  { %v1411_v43 = vpop.permute.xlu1 %310  ;;  %v1413_v16 = vpop.permute.xlu0 %308 }
 0x109   :  { %v278_v39 = vmax.f32 %v198_v33, %v1335_v1 }
 0x10b   :  { %v342_v9 = vmax.f32 %v278_v39, %v1384_v37 }
 0x10c   :  { %v415_v5 = vpop.permute.xlu1 %414  ;;  %v413_v22 = vpop.permute.xlu0 %412 }
 0x10d   :  { %v453_v36 = vmax.f32 %v373_v8, %v415_v5  ;;  %v170_v5 = vmax.f32 %v106_v42, %v1325_v4 }
 0x110   :  { %v475_v14 = vpop.permute.xlu1 %474  ;;  %v473_v54 = vpop.permute.xlu0 %472 }
 0x111   :  { %v1421_v0 = vmax.f32 %v451_v29, %v475_v14  ;;  %v1423_v34 = vmax.f32 %v450_v28, %v473_v54  ;;  %v452_v29 = vmax.f32 %v372_v44, %v413_v22  ;;  %v168_v28 = vmax.f32 %v104_v21, %v1305_v6  ;;  %v1689_v6 = vld [vmem:[#allocation10_spill] sm:$0xff] }
 0x112   :  { %v201_v22 = vmax.f32 %v1307_v7, %v1689_v6  ;;  %v1693_v44 = vld [vmem:[#allocation14_spill] sm:$0xff]  ;;  %v202_v21 = vmax.f32 %v170_v5, %v1694_v57 }
 0x113   :  { %v531_v12 = vsub.f32 1.0, %v1421_v0  ;;  %v530_v46 = vsub.f32 1.0, %v1423_v34  ;;  %v200_v37 = vmax.f32 %v168_v28, %v1690_v30  ;;  %v203_v56 = vmax.f32 %v1329_v23, %v1693_v44  ;;  %v1698_v30 = vld [vmem:[#allocation22_spill] sm:$0xff] }
 0x114   :  { %v1431_v52 = vpop.permute.xlu1 %314  ;;  %v1433_v47 = vpop.permute.xlu0 %312  ;;  %v281_v15 = vmax.f32 %v201_v22, %v1374_v49  ;;  %v1697_v22 = vld [vmem:[#allocation21_spill] sm:$0xff] }
 0x115   :  { %v562_v48 = vsel %vm540_vm0, %v531_v12, 0.0  ;;  %v559_v20 = vsel %vm540_vm0, %v530_v46, 0.0  ;;  %v280_v7 = vmax.f32 %v200_v37, %v1376_v50  ;;  %v283_v50 = vmax.f32 %v203_v56, %v1401_v11 }
 0x116   :  { %563 = vadd.xlane.f32.xlu0 %v562_v48  ;;  %560 = vadd.xlane.f32.xlu1 %v559_v20  ;;  %v375_v48 = vmax.f32 %v343_v60, %v1691_v10  ;;  %v1692_v20 = vld [vmem:[#allocation18_spill] sm:$0xff]  ;;  %v345_v39 = vmax.f32 %v281_v15, %v1411_v43 }
 0x117   :  { %v374_v25 = vmax.f32 %v342_v9, %v1692_v20  ;;  %v347_v60 = vmax.f32 %v283_v50, %v1431_v52  ;;  %v1695_v9 = vld [vmem:[#allocation19_spill] sm:$0xff] }
 0x118   :  { %v419_v24 = vpop.permute.xlu1 %418  ;;  %v417_v55 = vpop.permute.xlu0 %416 }
 0x119   :  { %v455_v33 = vmax.f32 %v375_v48, %v419_v24  ;;  %v454_v8 = vmax.f32 %v374_v25, %v417_v55  ;;  %v282_v24 = vmax.f32 %v202_v21, %v1403_v31 }
 0x11b   :  { %v346_v43 = vmax.f32 %v282_v24, %v1433_v47  ;;  %v379_v47 = vmax.f32 %v347_v60, %v1697_v22 }
 0x11c   :  { %v479_v14 = vpop.permute.xlu1 %478  ;;  %v477_v54 = vpop.permute.xlu0 %476 }
 0x11d   :  { %v1458_v58 = vmax.f32 %v453_v36, %v479_v14  ;;  %v1460_v59 = vmax.f32 %v452_v29, %v477_v54  ;;  %v344_v36 = vmax.f32 %v280_v7, %v1413_v16  ;;  %v377_v16 = vmax.f32 %v345_v39, %v1695_v9 }
 0x11e   :  { %v378_v37 = vmax.f32 %v346_v43, %v1698_v30 }
 0x11f   :  { %v533_v53 = vsub.f32 1.0, %v1458_v58  ;;  %v532_v1 = vsub.f32 1.0, %v1460_v59  ;;  %v376_v41 = vmax.f32 %v344_v36, %v1696_v17 }
 0x120   :  { %v423_v61 = vpop.permute.xlu1 %422  ;;  %v421_v35 = vpop.permute.xlu0 %420 }
 0x121   :  { %v568_v32 = vsel %vm540_vm0, %v533_v53, 0.0  ;;  %v565_v4 = vsel %vm540_vm0, %v532_v1, 0.0  ;;  %v457_v42 = vmax.f32 %v377_v16, %v423_v61  ;;  %v456_v5 = vmax.f32 %v376_v41, %v421_v35 }
 0x122   :  { %569 = vadd.xlane.f32.xlu0 %v568_v32  ;;  %566 = vadd.xlane.f32.xlu1 %v565_v4 }
 0x124   :  { %v483_v49 = vpop.permute.xlu1 %482  ;;  %v481_v18 = vpop.permute.xlu0 %480 }
 0x125   :  { %v1485_v29 = vmax.f32 %v455_v33, %v483_v49  ;;  %v1487_v28 = vmax.f32 %v454_v8, %v481_v18 }
 0x127   :  { %v535_v55 = vsub.f32 1.0, %v1485_v29  ;;  %v534_v23 = vsub.f32 1.0, %v1487_v28 }
 0x128   :  { %v427_v14 = vpop.permute.xlu1 %426  ;;  %v425_v54 = vpop.permute.xlu0 %424 }
 0x129   :  { %v574_v11 = vsel %vm540_vm0, %v535_v55, 0.0  ;;  %v571_v31 = vsel %vm540_vm0, %v534_v23, 0.0  ;;  %v459_v20 = vmax.f32 %v379_v47, %v427_v14  ;;  %v458_v25 = vmax.f32 %v378_v37, %v425_v54 }
 0x12a   :  { %575 = vadd.xlane.f32.xlu0 %v574_v11  ;;  %572 = vadd.xlane.f32.xlu1 %v571_v31 }
 0x12c   :  { %v487_v6 = vpop.permute.xlu1 %486  ;;  %v485_v52 = vpop.permute.xlu0 %484 }
 0x12d   :  { %v1505_v10 = vmax.f32 %v457_v42, %v487_v6  ;;  %v1507_v48 = vmax.f32 %v456_v5, %v485_v52 }
 0x12f   :  { %v537_v15 = vsub.f32 1.0, %v1505_v10  ;;  %v536_v32 = vsub.f32 1.0, %v1507_v48 }
 0x130   :  { %v491_v61 = vpop.permute.xlu1 %490  ;;  %v489_v35 = vpop.permute.xlu0 %488 }
 0x131   :  { %v1511_v4 = vmax.f32 %v459_v20, %v491_v61  ;;  %v1513_v7 = vmax.f32 %v458_v25, %v489_v35  ;;  %v580_v33 = vsel %vm540_vm0, %v537_v15, 0.0  ;;  %v577_v8 = vsel %vm540_vm0, %v536_v32, 0.0 }
 0x132   :  { %581 = vadd.xlane.f32.xlu0 %v580_v33  ;;  %578 = vadd.xlane.f32.xlu1 %v577_v8 }
 0x133   :  { %v539_v44 = vsub.f32 1.0, %v1511_v4  ;;  %v1662_v56 = vsub.f32 1.0, %v1513_v7 }
 0x135   :  { %v586_v57 = vsel %vm540_vm0, %v539_v44, 0.0  ;;  %v583_v21 = vsel %vm540_vm0, %v1662_v56, 0.0 }
 0x136   :  { %587 = vadd.xlane.f32.xlu0 %v586_v57  ;;  %584 = vadd.xlane.f32.xlu1 %v583_v21 }
 0x17f   :  { %v543_v49 = vpop.xlane.xlu0 %542  ;;  %v546_v39 = vpop.xlane.xlu1 %545 }
 0x180   :  { %v589_v54 = vadd.f32 %v546_v39, %v543_v49 }
 0x182   :  { %v590_v41 = vrot.slane %v589_v54, 4 }
 0x183   :  { %v549_v18 = vpop.xlane.xlu0 %548 }
 0x184   :  { %v591_v22 = vadd.f32 %v590_v41, %v589_v54 }
 0x186   :  { %v592_v25 = vrot.slane %v591_v22, 2 }
 0x187   :  { %v552_v36 = vpop.xlane.xlu0 %551 }
 0x188   :  { %v596_v14 = vadd.f32 %v552_v36, %v549_v18  ;;  %v593_v39 = vadd.f32 %v592_v25, %v591_v22 }
 0x18a   :  { %v597_v16 = vrot.slane %v596_v14, 4 }
 0x18c   :  { %v598_v6 = vadd.f32 %v597_v16, %v596_v14 }
 0x18e   :  { %v599_v37 = vrot.slane %v598_v6, 2 }
 0x190   :  { %v600_v21 = vadd.f32 %v599_v37, %v598_v6 }
 0x192   :  { %v601_v14 = vrot.slane %v600_v21, 1 }
 0x193   :  { %v555_v50 = vpop.xlane.xlu1 %554  ;;  %v558_v24 = vpop.xlane.xlu0 %557 }
 0x194   :  { %v603_v9 = vadd.f32 %v558_v24, %v555_v50 }
 0x196   :  { %v604_v42 = vrot.slane %v603_v9, 4 }
 0x198   :  { %v605_v47 = vadd.f32 %v604_v42, %v603_v9 }
 0x19a   :  { %v606_v33 = vrot.slane %v605_v47, 2 }
 0x19c   :  { %v607_v36 = vadd.f32 %v606_v33, %v605_v47 }
 0x1a3   :  { %v561_v60 = vpop.xlane.xlu1 %560  ;;  %v564_v43 = vpop.xlane.xlu0 %563 }
 0x1a4   :  { %v610_v17 = vadd.f32 %v564_v43, %v561_v60  ;;  %v594_v43 = vrot.slane %v593_v39, 1 }
 0x1a6   :  { %v611_v52 = vrot.slane %v610_v17, 4  ;;  %v595_v6 = vadd.f32 %v594_v43, %v593_v39 }
 0x1a8   :  { %v612_v20 = vadd.f32 %v611_v52, %v610_v17  ;;  %v608_v17 = vrot.slane %v607_v36, 1 }
 0x1aa   :  { %v613_v49 = vrot.slane %v612_v20, 2  ;;  %v609_v22 = vadd.f32 %v608_v17, %v607_v36 }
 0x1ac   :  { %v614_v60 = vadd.f32 %v613_v49, %v612_v20 }
 0x1ae   :  { %v615_v42 = vrot.slane %v614_v60, 1 }
 0x1af   :  { %v567_v11 = vpop.xlane.xlu1 %566  ;;  %v570_v31 = vpop.xlane.xlu0 %569 }
 0x1b0   :  { %v617_v5 = vadd.f32 %v570_v31, %v567_v11  ;;  %v602_v31 = vadd.f32 %v601_v14, %v600_v21  ;;  %v616_v20 = vadd.f32 %v615_v42, %v614_v60  ;;  %v655_v60 = vld [vmem:[%s1644_s0 + $0x8] sm:$0xff]  ;;  %v656_v42 = vld [vmem:[%s1644_s0 + $0x10] sm:$0xff] }
 0x1b1   :  { %v672_v2 = vmul.f32 %v656_v42, %v526_v51 }
 0x1b2   :  { %v618_v30 = vrot.slane %v617_v5, 4 }
 0x1b4   :  { %v619_v8 = vadd.f32 %v618_v30, %v617_v5 }
 0x1b6   :  { %v620_v50 = vrot.slane %v619_v8, 2 }
 0x1b7   :  { %v573_v61 = vpop.xlane.xlu1 %572  ;;  %v576_v35 = vpop.xlane.xlu0 %575 }
 0x1b8   :  { %v624_v57 = vadd.f32 %v576_v35, %v573_v61  ;;  %v621_v41 = vadd.f32 %v620_v50, %v619_v8  ;;  %v645_v35 = vadd.f32 %v602_v31, %v595_v6  ;;  %v661_v6 = vld [vmem:[%s1644_s0 + $0x38] sm:$0xff] }
 0x1b9   :  { %v677_v45 = vmul.f32 %v661_v6, %v531_v12  ;;  %v1699_v12 = vsub.f32 1.0, %v1513_v7 }
 0x1ba   :  { %v625_v18 = vrot.slane %v624_v57, 4  ;;  %v622_v47 = vrot.slane %v621_v41, 1 }
 0x1bc   :  { %v626_v24 = vadd.f32 %v625_v18, %v624_v57  ;;  %v646_v18 = vadd.f32 %v645_v35, %v609_v22  ;;  %v623_v56 = vadd.f32 %v622_v47, %v621_v41  ;;  %v654_v41 = vld [vmem:[%s1644_s0] sm:$0xff]  ;;  %v671_v47 = vmul.f32 %v655_v60, %v525_v26  ;;  %v667_v35 = vld [vmem:[%s1644_s0 + $0x68] sm:$0xff] }
 0x1bd   :  { %v662_v22 = vld [vmem:[%s1644_s0 + $0x40] sm:$0xff] }
 0x1be   :  { %v627_v54 = vrot.slane %v626_v24, 2  ;;  %v647_v21 = vadd.f32 %v646_v18, %v616_v20  ;;  %v670_v20 = vmul.f32 %v654_v41, %v524_v27  ;;  %v678_v19 = vmul.f32 %v662_v22, %v532_v1 }
 0x1bf   :  { %v579_v9 = vpop.xlane.xlu1 %578  ;;  %v582_v16 = vpop.xlane.xlu0 %581 }
 0x1c0   :  { %v631_v11 = vadd.f32 %v582_v16, %v579_v9  ;;  %v628_v5 = vadd.f32 %v627_v54, %v626_v24  ;;  %v648_v39 = vadd.f32 %v647_v21, %v623_v56  ;;  %v657_v56 = vld [vmem:[%s1644_s0 + $0x18] sm:$0xff] }
 0x1c2   :  { %v632_v52 = vrot.slane %v631_v11, 4  ;;  %v629_v33 = vrot.slane %v628_v5, 1 }
 0x1c3   :  { %v585_v30 = vpop.xlane.xlu1 %584  ;;  %v588_v37 = vpop.xlane.xlu0 %587 }
 0x1c4   :  { %v633_v25 = vadd.f32 %v632_v52, %v631_v11  ;;  %v638_v61 = vadd.f32 %v588_v37, %v585_v30  ;;  %v630_v14 = vadd.f32 %v629_v33, %v628_v5  ;;  %v659_v5 = vld [vmem:[%s1644_s0 + $0x28] sm:$0xff]  ;;  %v658_v52 = vld [vmem:[%s1644_s0 + $0x20] sm:$0xff]  ;;  %v660_v30 = vld [vmem:[%s1644_s0 + $0x30] sm:$0xff]  ;;  %v673_v33 = vmul.f32 %v657_v56, %v527_v3 }
 0x1c5   :  { %v663_v37 = vld [vmem:[%s1644_s0 + $0x48] sm:$0xff]  ;;  %v675_v26 = vmul.f32 %v659_v5, %v529_v63  ;;  %v674_v13 = vmul.f32 %v658_v52, %v528_v40  ;;  %v676_v51 = vmul.f32 %v660_v30, %v530_v46  ;;  %v683_v40 = vmul.f32 %v667_v35, %v537_v15 }
 0x1c6   :  { %v634_v57 = vrot.slane %v633_v25, 2  ;;  %v639_v49 = vrot.slane %v638_v61, 4  ;;  %v649_v36 = vadd.f32 %v648_v39, %v630_v14  ;;  %v679_v3 = vmul.f32 %v663_v37, %v533_v53 }
 0x1c7   :  { %v684_v46 = vmul.f32 %v668_v38, %v1699_v12 }
 0x1c8   :  { %v635_v8 = vadd.f32 %v634_v57, %v633_v25  ;;  %v640_v50 = vadd.f32 %v639_v49, %v638_v61  ;;  %v665_v25 = vld [vmem:[%s1644_s0 + $0x58] sm:$0xff]  ;;  %v664_v61 = vld [vmem:[%s1644_s0 + $0x50] sm:$0xff]  ;;  %v666_v57 = vld [vmem:[%s1644_s0 + $0x60] sm:$0xff] }
 0x1c9   :  { %v669_v49 = vld [vmem:[%s1644_s0 + $0x78] sm:$0xff]  ;;  %v681_v63 = vmul.f32 %v665_v25, %v535_v55  ;;  %v680_v18 = vmul.f32 %v664_v61, %v534_v23  ;;  %v682_v0 = vmul.f32 %v666_v57, %v536_v32  ;;  %s767_s0 = smov [#allocation2]  }
 0x1ca   :  { %v636_v24 = vrot.slane %v635_v8, 1  ;;  %v641_v54 = vrot.slane %v640_v50, 2  ;;  %v685_v34 = vmul.f32 %v669_v49, %v539_v44  ;;  %s723_s28 = sshll.u32 %s767_s0, 4  ;;  %s1613_s28 = int_to_ptr.vmem [resolvable:$true] %s723_s28 }
 0x1cb   :  { %s741_s29 = scalar_lea.vmem %s1613_s28, 2048  ;;  %p746_p1 = scmp.lt.s32.totalorder %s1613_s28, %s1613_s28 }
 0x1cc   :  { %v637_v43 = vadd.f32 %v636_v24, %v635_v8  ;;  %v642_v9 = vadd.f32 %v641_v54, %v640_v50  ;;  %p742_p0 = scmp.ne.s32.totalorder %s1613_s28, %s741_s29  ;;  %p747_p2 = scmp.lt.s32.totalorder %s741_s29, %s741_s29 }
 0x1ce   :  { %v643_v16 = vrot.slane %v642_v9, 1  ;;  %v650_v17 = vadd.f32 %v649_v36, %v637_v43  ;;  %p748_p3 = por %p747_p2, %p746_p1 }
 0x1d0   :  { %v644_v11 = vadd.f32 %v643_v16, %v642_v9  ;;  %p749_p4 = pnand %p748_p3, %p742_p0 }
 0x1d2   :  { %v651_v31 = vadd.f32 %v650_v17, %v644_v11 }
 0x1d4   :  { %739 = vrcp.f32 %v651_v31 }
 0x1de   :  { %v740_v27 = vpop.eup %739 }
 0x1df   :  { %v653_v62 = vmul.f32 2048.0, %v740_v27 }
 0x1e1   :  { %v686_v58 = vmul.f32 %v670_v20, %v653_v62  ;;  %v687_v59 = vmul.f32 %v671_v47, %v653_v62  ;;  %v688_v53 = vmul.f32 %v672_v2, %v653_v62  ;;  %v689_v1 = vmul.f32 %v673_v33, %v653_v62 }
 0x1e2   :  { %v690_v29 = vmul.f32 %v674_v13, %v653_v62  ;;  %v691_v28 = vmul.f32 %v675_v26, %v653_v62  ;;  %v692_v55 = vmul.f32 %v676_v51, %v653_v62  ;;  %v693_v23 = vmul.f32 %v677_v45, %v653_v62 }
 0x1e3   :  { %v694_v10 = vmul.f32 %v678_v19, %v653_v62  ;;  %v695_v15 = vmul.f32 %v679_v3, %v653_v62  ;;  %v696_v48 = vmul.f32 %v680_v18, %v653_v62  ;;  %v697_v32 = vmul.f32 %v681_v63, %v653_v62  ;;  %702 = vst.msk [vmem:[#allocation2] sm:$0xff] %vm540_vm0, %v686_v58 }
 0x1e4   :  { %703 = vst.msk [vmem:[#allocation2 + $0x8] sm:$0xff] %vm540_vm0, %v687_v59  ;;  %704 = vst.msk [vmem:[#allocation2 + $0x10] sm:$0xff] %vm540_vm0, %v688_v53  ;;  %v698_v4 = vmul.f32 %v682_v0, %v653_v62  ;;  %v699_v7 = vmul.f32 %v683_v40, %v653_v62  ;;  %v700_v44 = vmul.f32 %v684_v46, %v653_v62 }
 0x1e5   :  { %705 = vst.msk [vmem:[#allocation2 + $0x18] sm:$0xff] %vm540_vm0, %v689_v1  ;;  %v701_v8 = vmul.f32 %v685_v34, %v653_v62  ;;  %706 = vst.msk [vmem:[#allocation2 + $0x20] sm:$0xff] %vm540_vm0, %v690_v29 }
 0x1e6   :  { %707 = vst.msk [vmem:[#allocation2 + $0x28] sm:$0xff] %vm540_vm0, %v691_v28  ;;  %708 = vst.msk [vmem:[#allocation2 + $0x30] sm:$0xff] %vm540_vm0, %v692_v55 }
 0x1e7   :  { %709 = vst.msk [vmem:[#allocation2 + $0x38] sm:$0xff] %vm540_vm0, %v693_v23  ;;  %710 = vst.msk [vmem:[#allocation2 + $0x40] sm:$0xff] %vm540_vm0, %v694_v10 }
 0x1e8   :  { %711 = vst.msk [vmem:[#allocation2 + $0x48] sm:$0xff] %vm540_vm0, %v695_v15  ;;  %712 = vst.msk [vmem:[#allocation2 + $0x50] sm:$0xff] %vm540_vm0, %v696_v48 }
 0x1e9   :  { %713 = vst.msk [vmem:[#allocation2 + $0x58] sm:$0xff] %vm540_vm0, %v697_v32  ;;  %714 = vst.msk [vmem:[#allocation2 + $0x60] sm:$0xff] %vm540_vm0, %v698_v4 }
 0x1ea   :  { %715 = vst.msk [vmem:[#allocation2 + $0x68] sm:$0xff] %vm540_vm0, %v699_v7  ;;  %716 = vst.msk [vmem:[#allocation2 + $0x70] sm:$0xff] %vm540_vm0, %v700_v44 }
 0x1eb   :  { %717 = vst.msk [vmem:[#allocation2 + $0x78] sm:$0xff] %vm540_vm0, %v701_v8 }
 0x1ec   :  { %752 = shalt.err (!%p749_p4)
}
 0x1ed   :  { %s753_s4 = scalar_lea.hbm %s1646_s2, 2048 }
 0x1ee   :  { %p754_p5 = scmp.ne.s32.totalorder %s1646_s2, %s753_s4  ;;  %p757_p6 = scmp.lt.u32.totalorder %s753_s4, %s1646_s2 }
 0x1f0   :  { %p759_p7 = pnand %p757_p6, %p754_p5 }
 0x1f2   :  { %762 = shalt.err (!%p759_p7)
}
 0x1f3   :  { %s768_s9 = smov 128   ;;  %s769_s10 = smov 8  }
 0x1f4   :  { %729 = dma.vmem_to_hbm [thread:$0]  %s1613_s28, 2048, %s1646_s2, [#allocation3], %s768_s9, %s768_s9, %s769_s10  }
 0x1f5   :  { %763 = dma.done.wait [#allocation3], 2048  }
 0x1f6   :  { %764 = vsyncadd [#allocation3], 4294965248 }
 0x1f7   :  { %733 = vsyncpa [#allocation3], 1 }

</bundles_post_ra>
